<compile_context>
chip_gen: v6e
topology: v6e:2x2x1
jax: 0.10.0
libtpu: 0.0.40
codegen_flags: <defaults>
</compile_context>

<pallas_src>
import functools

import jax
import jax.numpy as jnp
from jax import lax
from jax.experimental import pallas as pl
from jax.experimental.pallas import tpu as pltpu


def _round_up(x, m):
    return ((x + m - 1) // m) * m


@functools.lru_cache(maxsize=1)
def _vmem_cap_bytes():
    """Physical per-core VMEM capacity; conservative fallback if unqueryable."""
    try:
        return int(pltpu.get_tpu_info().vmem_capacity_bytes)
    except Exception:
        return 64 * 1024 * 1024          # v7x per-TC size: safe lower bound


def _pick_tf(F, tf_req):
    """Largest lane-aligned F-chunk <= tf_req that divides F."""
    for cand in (4096, 2048, 1024, 512, 256, 128):
        if cand <= tf_req and F % cand == 0:
            return cand
    return F                              # odd F: fall back to unchunked


def _ffn_kernel(x_ref, w1_ref, b1_ref, w2_ref, b2_ref, o_ref, acc_ref, *, tf, n_f):
    # x_ref : (tm, E) input dtype     w1_ref: (E, F) bf16   b1_ref: (1, F) f32
    # w2_ref: (F, E) bf16             b2_ref: (1, E) f32
    # o_ref : (tm, E) out dtype       acc_ref: (tm, E) f32 VMEM scratch
    x = x_ref[...].astype(jnp.bfloat16)        # in-kernel cast: free filler under MXU
    acc_ref[...] = jnp.zeros_like(acc_ref)

    def f_chunk(f, carry):
        f0 = pl.multiple_of(f * tf, tf)
        h = jnp.dot(x, w1_ref[:, pl.ds(f0, tf)],
                    preferred_element_type=jnp.float32)
        h = jnp.maximum(h + b1_ref[:, pl.ds(f0, tf)], 0.0)       # f32 bias + ReLU
        # TODO(synk): training-mode dropout not applied (module reproduced in
        #             eval mode); if added, do it here in-kernel with
        #             pltpu.prng_seed(seed + pl.program_id(0)) + prng_random_bits.
        acc_ref[...] += jnp.dot(h.astype(jnp.bfloat16),
                                w2_ref[pl.ds(f0, tf), :],
                                preferred_element_type=jnp.float32)
        return carry

    lax.fori_loop(0, n_f, f_chunk, 0, unroll=(n_f <= 8))
    o_ref[...] = (acc_ref[...] + b2_ref[...]).astype(o_ref.dtype)


def prepare_params(w1, b1, w2, b2):
    """One-time (off the hot path) conversion: bf16 weights, 2-D f32 biases."""
    E, F = w1.shape
    return (w1.astype(jnp.bfloat16),
            b1.reshape(1, F).astype(jnp.float32),
            w2.astype(jnp.bfloat16),
            b2.reshape(1, E).astype(jnp.float32))


@functools.partial(jax.jit, static_argnames=("tm", "tf", "out_dtype"))
def position_wise_feed_forward(x, w1, b1, w2, b2, *, tm=512, tf=2048, out_dtype=None):
    """x: [B, S, E] (any float dtype).  w1/b1/w2/b2: as returned by prepare_params.
    Returns [B, S, E] in out_dtype (default: x.dtype)."""
    B, S, E = x.shape
    F = w1.shape[1]
    M = B * S
    if out_dtype is None:
        out_dtype = x.dtype
    out_itemsize = jnp.dtype(out_dtype).itemsize
    x_itemsize = jnp.dtype(x.dtype).itemsize

    x2d = x.reshape(M, E)                       # no dtype cast here (done in-kernel)

    # Row tile: big for MXU occupancy / DMA efficiency; multiple of 8 suffices
    # for the f32 input block.  Ragged last tile handled by Pallas masked writeback.
    tm = max(8, min(tm, _round_up(M, 8)))
    grid = (pl.cdiv(M, tm),)

    # F-chunk width for the in-kernel loop (bounds the live (tm, tf) intermediate).
    tf = _pick_tf(F, tf)
    n_f = F // tf

    # Generation-aware VMEM budget (85% of physical per-core VMEM).
    weight_bytes = 2 * E * F * 2 + (F + E) * 4             # resident bf16 W1+W2, f32 biases
    tile_bytes = 2 * tm * E * x_itemsize + 2 * tm * E * out_itemsize
    scratch_bytes = tm * E * 4 + tm * tf * 4               # f32 acc + live h chunk
    needed = weight_bytes + tile_bytes + scratch_bytes
    cap = int(0.85 * _vmem_cap_bytes())
    vmem_limit = min(cap, max(32 * 1024 * 1024, int(1.5 * needed)))
    # TODO(synk): if `needed` > cap (very large E on v7x's 64 MiB/TC — note the
    #             resident weights are duplicated per TensorCore under
    #             dimension_semantics="parallel"), switch to streaming W1/W2
    #             over a second grid axis instead of keeping both resident.

    const2 = lambda i: (0, 0)
    resident = pl.Buffered(1)      # constant index_map -> single VMEM copy

    out = pl.pallas_call(
        functools.partial(_ffn_kernel, tf=tf, n_f=n_f),
        out_shape=jax.ShapeDtypeStruct((M, E), out_dtype),
        grid_spec=pltpu.PrefetchScalarGridSpec(
            num_scalar_prefetch=0,
            grid=grid,
            in_specs=[
                pl.BlockSpec((tm, E), lambda i: (i, 0)),                  # x tile
                pl.BlockSpec((E, F), const2, pipeline_mode=resident),     # W1 (bf16)
                pl.BlockSpec((1, F), const2, pipeline_mode=resident),     # b1 (f32)
                pl.BlockSpec((F, E), const2, pipeline_mode=resident),     # W2 (bf16)
                pl.BlockSpec((1, E), const2, pipeline_mode=resident),     # b2 (f32)
            ],
            out_specs=pl.BlockSpec((tm, E), lambda i: (i, 0)),
            scratch_shapes=[pltpu.VMEM((tm, E), jnp.float32)],
        ),
        compiler_params=pltpu.CompilerParams(
            dimension_semantics=("parallel",),      # shards row tiles across TCs on v7x
            vmem_limit_bytes=vmem_limit,
        ),
        cost_estimate=pl.CostEstimate(
            flops=4 * M * E * F,                     # two matmuls
            transcendentals=0,
            bytes_accessed=M * E * x_itemsize + M * E * out_itemsize + weight_bytes,
        ),
    )(x2d, w1, b1, w2, b2)

    return out.reshape(B, S, E)


def init_params(key, emb_dim):
    """Deterministic init matching nn.Linear's U(-1/sqrt(fan_in), 1/sqrt(fan_in))."""
    ff_dim = emb_dim * 4
    k1, k2, k3, k4 = jax.random.split(key, 4)
    bound1 = 1.0 / jnp.sqrt(emb_dim)
    bound2 = 1.0 / jnp.sqrt(ff_dim)
    # stored as [in, out] so the kernel computes x @ W
    w1 = jax.random.uniform(k1, (emb_dim, ff_dim), jnp.float32, -bound1, bound1)
    b1 = jax.random.uniform(k2, (ff_dim,), jnp.float32, -bound1, bound1)
    w2 = jax.random.uniform(k3, (ff_dim, emb_dim), jnp.float32, -bound2, bound2)
    b2 = jax.random.uniform(k4, (emb_dim,), jnp.float32, -bound2, bound2)
    return w1, b1, w2, b2


if __name__ == "__main__":
    key = jax.random.PRNGKey(0)
    batch, seq, emb_dim = 2, 8, 32          # ff_dim = 128

    kx, kp = jax.random.split(key)
    x = jax.random.normal(kx, (batch, seq, emb_dim), jnp.float32)
    w1, b1, w2, b2 = init_params(kp, emb_dim)
    params = prepare_params(w1, b1, w2, b2)   # bf16 weight cast happens ONCE, here

    y = position_wise_feed_forward(x, *params)
    y = jax.block_until_ready(y)
    assert y.shape == (batch, seq, emb_dim)

    # Reference mirroring the kernel numerics (bf16 operands, f32 accumulation).
    xb = x.reshape(-1, emb_dim).astype(jnp.bfloat16)
    h = jnp.dot(xb, w1.astype(jnp.bfloat16), preferred_element_type=jnp.float32) + b1
    h = jnp.maximum(h, 0.0)
    ref = jnp.dot(h.astype(jnp.bfloat16), w2.astype(jnp.bfloat16),
                  preferred_element_type=jnp.float32) + b2
    ref = ref.reshape(batch, seq, emb_dim)
    assert jnp.allclose(y, ref, atol=2e-3, rtol=2e-3), \
        float(jnp.max(jnp.abs(y - ref)))

    # Looser sanity check against the pure-f32 module semantics (eval-mode dropout).
    ref_f32 = jnp.maximum(x @ w1 + b1, 0.0) @ w2 + b2
    assert jnp.allclose(y, ref_f32, atol=5e-2, rtol=5e-2)

    print("KERNEL_OK")
</pallas_src>

<mosaic_0001>
module attributes {stable_mosaic.version = 11 : i64} {
  func.func @_ffn_kernel(%arg0: i32, %arg1: memref<16x32xf32, #tpu.memory_space<vmem>>, %arg2: memref<32x128xbf16, #tpu.memory_space<vmem>>, %arg3: memref<1x128xf32, #tpu.memory_space<vmem>>, %arg4: memref<128x32xbf16, #tpu.memory_space<vmem>>, %arg5: memref<1x32xf32, #tpu.memory_space<vmem>>, %arg6: memref<16x32xf32, #tpu.memory_space<vmem>>, %arg7: memref<16x32xf32, #tpu.memory_space<vmem>>) attributes {dimension_semantics = [#tpu.dimension_semantics<parallel>], iteration_bounds = array<i64: 1>, scalar_prefetch = 0 : i64, scratch_operands = 1 : i64, tpu.core_type = #tpu.core_type<tc>, window_params = [{transform_indices = @transform_0, window_bounds = array<i64: 16, 32>}, {pipeline_mode = #tpu.pipeline_mode<synchronous>, transform_indices = @transform_1, window_bounds = array<i64: 32, 128>}, {pipeline_mode = #tpu.pipeline_mode<synchronous>, transform_indices = @transform_2, window_bounds = array<i64: 1, 128>}, {pipeline_mode = #tpu.pipeline_mode<synchronous>, transform_indices = @transform_3, window_bounds = array<i64: 128, 32>}, {pipeline_mode = #tpu.pipeline_mode<synchronous>, transform_indices = @transform_4, window_bounds = array<i64: 1, 32>}, {transform_indices = @transform_5, window_bounds = array<i64: 16, 32>}]} {
    %c0 = arith.constant 0 : index
    %c0_0 = arith.constant 0 : index
    %0 = vector.load %arg1[%c0, %c0_0] : memref<16x32xf32, #tpu.memory_space<vmem>>, vector<16x32xf32>
    %1 = arith.truncf %0 : vector<16x32xf32> to vector<16x32xbf16>
    %cst = arith.constant 0.000000e+00 : f32
    %2 = vector.broadcast %cst : f32 to vector<16x32xf32>
    %c0_1 = arith.constant 0 : index
    %c0_2 = arith.constant 0 : index
    %3 = vector.load %arg7[%c0_1, %c0_2] : memref<16x32xf32, #tpu.memory_space<vmem>>, vector<16x32xf32>
    tpu.vector_store %arg7[%c0_1, %c0_2], %2 {strides = array<i32>} : memref<16x32xf32, #tpu.memory_space<vmem>>, vector<16x32xf32>,
    %c0_i32 = arith.constant 0 : i32
    %c128_i32 = arith.constant 128 : i32
    %4 = arith.muli %c0_i32, %c128_i32 : i32
    %5 = tpu.assume_multiple %4, 128 : i32
    %c0_3 = arith.constant 0 : index
    %6 = arith.index_cast %5 : i32 to index
    %7 = vector.load %arg2[%c0_3, %6] : memref<32x128xbf16, #tpu.memory_space<vmem>>, vector<32x128xbf16>
    %cst_4 = arith.constant dense<0.000000e+00> : vector<16x128xf32>
    %8 = tpu.matmul %1, %7, %cst_4 {dimension_numbers = #tpu.dot_dimension_numbers<[1], [0], [0], [1], [0, 0, 1, 1], [], []>} : vector<16x32xbf16>, vector<32x128xbf16>, vector<16x128xf32> -> vector<16x128xf32>
    %c0_5 = arith.constant 0 : index
    %9 = arith.index_cast %5 : i32 to index
    %10 = vector.load %arg3[%c0_5, %9] : memref<1x128xf32, #tpu.memory_space<vmem>>, vector<1x128xf32>
    %11 = vector.broadcast %10 : vector<1x128xf32> to vector<16x128xf32>
    %12 = arith.addf %8, %11 : vector<16x128xf32>
    %cst_6 = arith.constant 0.000000e+00 : f32
    %13 = vector.broadcast %cst_6 : f32 to vector<16x128xf32>
    %14 = arith.maximumf %12, %13 : vector<16x128xf32>
    %c0_7 = arith.constant 0 : index
    %c0_8 = arith.constant 0 : index
    %15 = vector.load %arg7[%c0_7, %c0_8] : memref<16x32xf32, #tpu.memory_space<vmem>>, vector<16x32xf32>
    %16 = arith.truncf %14 : vector<16x128xf32> to vector<16x128xbf16>
    %17 = arith.index_cast %5 : i32 to index
    %c0_9 = arith.constant 0 : index
    %18 = vector.load %arg4[%17, %c0_9] : memref<128x32xbf16, #tpu.memory_space<vmem>>, vector<128x32xbf16>
    %cst_10 = arith.constant dense<0.000000e+00> : vector<16x32xf32>
    %19 = tpu.matmul %16, %18, %cst_10 {dimension_numbers = #tpu.dot_dimension_numbers<[1], [0], [0], [1], [0, 0, 1, 1], [], []>} : vector<16x128xbf16>, vector<128x32xbf16>, vector<16x32xf32> -> vector<16x32xf32>
    %20 = arith.addf %15, %19 : vector<16x32xf32>
    %c0_11 = arith.constant 0 : index
    %c0_12 = arith.constant 0 : index
    %21 = vector.load %arg7[%c0_11, %c0_12] : memref<16x32xf32, #tpu.memory_space<vmem>>, vector<16x32xf32>
    tpu.vector_store %arg7[%c0_11, %c0_12], %20 {strides = array<i32>} : memref<16x32xf32, #tpu.memory_space<vmem>>, vector<16x32xf32>,
    %c1_i32 = arith.constant 1 : i32
    %c0_13 = arith.constant 0 : index
    %c0_14 = arith.constant 0 : index
    %22 = vector.load %arg7[%c0_13, %c0_14] : memref<16x32xf32, #tpu.memory_space<vmem>>, vector<16x32xf32>
    %c0_15 = arith.constant 0 : index
    %c0_16 = arith.constant 0 : index
    %23 = vector.load %arg5[%c0_15, %c0_16] : memref<1x32xf32, #tpu.memory_space<vmem>>, vector<1x32xf32>
    %24 = vector.broadcast %23 : vector<1x32xf32> to vector<16x32xf32>
    %25 = arith.addf %22, %24 : vector<16x32xf32>
    %c0_17 = arith.constant 0 : index
    %c0_18 = arith.constant 0 : index
    %26 = vector.load %arg6[%c0_17, %c0_18] : memref<16x32xf32, #tpu.memory_space<vmem>>, vector<16x32xf32>
    tpu.vector_store %arg6[%c0_17, %c0_18], %25 {strides = array<i32>} : memref<16x32xf32, #tpu.memory_space<vmem>>, vector<16x32xf32>,
    return
  }
  func.func @transform_0(%arg0: i32) -> (i32, i32) {
    %c0_i32 = arith.constant 0 : i32
    %c0_i32_0 = arith.constant 0 : i32
    return %arg0, %c0_i32 : i32, i32
  }
  func.func @transform_1(%arg0: i32) -> (i32, i32) {
    %c0_i32 = arith.constant 0 : i32
    %c0_i32_0 = arith.constant 0 : i32
    %c0_i32_1 = arith.constant 0 : i32
    return %c0_i32, %c0_i32_0 : i32, i32
  }
  func.func @transform_2(%arg0: i32) -> (i32, i32) {
    %c0_i32 = arith.constant 0 : i32
    %c0_i32_0 = arith.constant 0 : i32
    %c0_i32_1 = arith.constant 0 : i32
    return %c0_i32, %c0_i32_0 : i32, i32
  }
  func.func @transform_3(%arg0: i32) -> (i32, i32) {
    %c0_i32 = arith.constant 0 : i32
    %c0_i32_0 = arith.constant 0 : i32
    %c0_i32_1 = arith.constant 0 : i32
    return %c0_i32, %c0_i32_0 : i32, i32
  }
  func.func @transform_4(%arg0: i32) -> (i32, i32) {
    %c0_i32 = arith.constant 0 : i32
    %c0_i32_0 = arith.constant 0 : i32
    %c0_i32_1 = arith.constant 0 : i32
    return %c0_i32, %c0_i32_0 : i32, i32
  }
  func.func @transform_5(%arg0: i32) -> (i32, i32) {
    %c0_i32 = arith.constant 0 : i32
    %c0_i32_0 = arith.constant 0 : i32
    return %arg0, %c0_i32 : i32, i32
  }
}

</mosaic_0001>

<bundles_post_ra>
// kernel: position_wise_feed_forward.1
= control target key start
LH: loop header
LB: loop body
LE: loop exit
PB: predicated region body
PF: predicated region fallthrough
CT: control target
= control target key end

     0   :  { %v328_v1 = vmov 0.0   ;;  %vm329_vm0 = vmmov 0   ;;  %vm25_vm1 = vcmask 261120   ;;  %s415_s0 = inlined_call_operand.vmem [shape: f32[16,32], index: 0, kind: input, shape index: {}]   ;;  %s416_s1 = inlined_call_operand.vmem [shape: bf16[32,128], index: 1, kind: input, shape index: {}]   ;;  %s417_s2 = inlined_call_operand.vmem [shape: f32[1,128], index: 2, kind: input, shape index: {}]   ;;  %s418_s3 = inlined_call_operand.vmem [shape: bf16[128,32], index: 3, kind: input, shape index: {}]   ;;  %s419_s4 = inlined_call_operand.vmem [shape: f32[1,32], index: 4, kind: input, shape index: {}]   ;;  %s420_s5 = inlined_call_operand.hbm [shape: f32[16,32], index: 5, kind: output, shape index: {}]  }
   0x1   :  { %v296_v0 = vld [vmem:[%s416_s1 + $0x8] sm:$0xff]   ;;  %263 = vmatprep.subr.bf16.mxu0 %v328_v1  ;;  %v297_v2 = vld [vmem:[%s416_s1] sm:$0xff]   ;;  %271 = vmatprep.subr.bf16.mxu1 %v328_v1  ;;  %26 = vst.msk [vmem:[#allocation2] sm:$0xff] %vm25_vm1, %v328_v1  ;;  %27 = vst.msk [vmem:[#allocation2 + $0x8] sm:$0xff] %vm25_vm1, %v328_v1 }
   0x2   :  { %264 = vmatpush3.bf16.msra.mxu0 %v296_v0  ;;  %267 = vmatprep.mubr.msk.bf16.mxu0 %vm329_vm0, %v328_v1  ;;  %v22_v3 = vld [vmem:[%s415_s0] sm:$0xff]  ;;  %v23_v4 = vld [vmem:[%s415_s0 + $0x8] sm:$0xff]  ;;  %v298_v5 = vld [vmem:[%s418_s3 + $0x38] sm:$0xff]  }
   0x3   :  { %265 = vmatprep.subr.bf16.mxu0 %v328_v1  ;;  %287 = vmatprep.mubr.msk.bf16.mxu1 %vm329_vm0, %v328_v1  ;;  %v24_v6 = vpack.c.bf16 %v23_v4, %v22_v3  ;;  %v299_v7 = vld [vmem:[%s418_s3 + $0x30] sm:$0xff]   ;;  %v300_v8 = vld [vmem:[%s418_s3 + $0x28] sm:$0xff]  }
   0x4   :  { %272 = vmatpush3.bf16.msra.mxu1 %v298_v5 }
   0x5   :  { %273 = vmatprep.subr.bf16.mxu1 %v328_v1 }
   0x6   :  { %266 = vmatpush3.bf16.msra.mxu0 %v297_v2 }
   0x8   :  { %274 = vmatpush3.bf16.msra.mxu1 %v299_v7 }
   0x9   :  { %268 = vmatmul.mubr.msk.bf16.vlgmr.msra.gmra.mxu0 %vm25_vm1, %v24_v6  ;;  %275 = vmatprep.subr.bf16.mxu1 %v328_v1 }
   0xa   :  { %10 = vsyncpa [#allocation4], 0  ;;  %v301_v9 = vld [vmem:[%s418_s3 + $0x20] sm:$0xff]   ;;  %v302_v10 = vld [vmem:[%s418_s3 + $0x18] sm:$0xff]   ;;  %s330_s17 = smov [#allocation3]  }
   0xb   :  { %v303_v11 = vld [vmem:[%s418_s3 + $0x10] sm:$0xff]   ;;  %v304_v12 = vld [vmem:[%s418_s3 + $0x8] sm:$0xff]   ;;  %v305_v13 = vld [vmem:[%s418_s3] sm:$0xff]   ;;  %s227_s18 = sshll.u32 %s330_s17, 4  ;;  %s228_s18 = int_to_ptr.vmem [resolvable:$true] %s227_s18 }
   0xc   :  { %276 = vmatpush3.bf16.msra.mxu1 %v300_v8  ;;  %v238_v14 = vld [vmem:[%s417_s2] ss:$0 sm:$0xff]  ;;  %v98_v28 = vld [vmem:[#allocation2 + $0x8] sm:$0xff]  ;;  %s306_s19 = scalar_lea.vmem %s228_s18, 256  ;;  %p311_p1 = scmp.lt.s32.totalorder %s228_s18, %s228_s18 }
   0xd   :  { %277 = vmatprep.subr.bf16.mxu1 %v328_v1  ;;  %v97_v24 = vld [vmem:[#allocation2] sm:$0xff]  ;;  %p307_p0 = scmp.ne.s32.totalorder %s228_s18, %s306_s19  ;;  %p312_p2 = scmp.lt.s32.totalorder %s306_s19, %s306_s19 }
   0xe   :  { %v250_v32 = vld [vmem:[%s419_s4] ss:$0 sm:$0xff] }
   0xf   :  { %p313_p3 = por %p312_p2, %p311_p1 }
  0x10   :  { %278 = vmatpush3.bf16.msra.mxu1 %v301_v9 }
  0x11   :  { %279 = vmatprep.subr.bf16.mxu1 %v328_v1  ;;  %p314_p4 = pnand %p313_p3, %p307_p0 }
  0x14   :  { %280 = vmatpush3.bf16.msra.mxu1 %v302_v10 }
  0x15   :  { %281 = vmatprep.subr.bf16.mxu1 %v328_v1 }
  0x18   :  { %282 = vmatpush3.bf16.msra.mxu1 %v303_v11 }
  0x19   :  { %283 = vmatprep.subr.bf16.mxu1 %v328_v1 }
  0x1c   :  { %284 = vmatpush3.bf16.msra.mxu1 %v304_v12 }
  0x1d   :  { %285 = vmatprep.subr.bf16.mxu1 %v328_v1 }
  0x20   :  { %286 = vmatpush3.bf16.msra.mxu1 %v305_v13 }
  0xc9   :  { %v88_v15 = vpop.f32.mrf.mxu0 }
  0xca   :  { %v89_v17 = vadd.f32 %v238_v14, %v88_v15 }
  0xcb   :  { %v269_v16 = vpop.f32.mrf.mxu0 }
  0xcc   :  { %v95_v21 = vmax.f32 %v89_v17, 0.0 }
  0xcd   :  { %v91_v18 = vpop.f32.mrf.mxu0 }
  0xce   :  { %v92_v19 = vadd.f32 %v238_v14, %v91_v18 }
  0xcf   :  { %v270_v20 = vpop.f32.mrf.mxu0 }
  0xd0   :  { %v96_v22 = vmax.f32 %v92_v19, 0.0 }
  0xd2   :  { %v99_v23 = vpack.c.bf16 %v96_v22, %v95_v21 }
  0xd4   :  { %288 = vmatmul.mubr.bf16.vlgmr.msra.gmra.mxu1 %v99_v23 }
 0x194   :  { %v198_v25 = vpop.f32.mrf.mxu1 }
 0x195   :  { %v205_v26 = vadd.f32 %v198_v25, %v97_v24 }
 0x196   :  { %v289_v27 = vpop.f32.mrf.mxu1 }
 0x197   :  { %207 = vst.msk [vmem:[#allocation2] sm:$0xff] %vm25_vm1, %v205_v26 }
 0x198   :  { %v201_v29 = vpop.f32.mrf.mxu1 }
 0x199   :  { %v206_v30 = vadd.f32 %v201_v29, %v98_v28 }
 0x19a   :  { %v290_v31 = vpop.f32.mrf.mxu1 }
 0x19b   :  { %208 = vst.msk [vmem:[#allocation2 + $0x8] sm:$0xff] %vm25_vm1, %v206_v30 }
 0x19e   :  { %v209_v33 = vld [vmem:[#allocation2] sm:$0xff] }
 0x19f   :  { %v218_v34 = vadd.f32 %v250_v32, %v209_v33 }
 0x1a1   :  { %220 = vst.msk [vmem:[#allocation3] sm:$0xff] %vm25_vm1, %v218_v34 }
 0x1a2   :  { %v210_v35 = vld [vmem:[#allocation2 + $0x8] sm:$0xff] }
 0x1a3   :  { %v219_v36 = vadd.f32 %v250_v32, %v210_v35 }
 0x1a5   :  { %221 = vst.msk [vmem:[#allocation3 + $0x8] sm:$0xff] %vm25_vm1, %v219_v36 }
 0x1a6   :  { %317 = shalt.err (!%p314_p4)
}
 0x1a7   :  { %s331_s20 = smov 128   ;;  %s332_s4 = smov 8  }
 0x1a8   :  { %233 = dma.vmem_to_hbm [thread:$0]  %s228_s18, 256, %s420_s5, [#allocation4], %s331_s20, %s331_s20, %s332_s4  }
 0x1a9   :  { %326 = dma.done.wait [#allocation4], 256  }
 0x1aa   :  { %327 = vsyncadd [#allocation4], 4294967040 }
 0x1ab   :  { %237 = vsyncpa [#allocation4], 1 }

</bundles_post_ra>
